<compile_context>
chip_gen: v7x
topology: tpu7x:2x2x1
jax: 0.10.0
libtpu: 0.0.40
codegen_flags: <defaults>
</compile_context>

<pallas_src>
import functools
from typing import List

import jax
import jax.numpy as jnp
from jax.experimental import pallas as pl
from jax.experimental.pallas import tpu as pltpu

_BN_EPS = 1e-5
_LANE = 128   # lane (last-dim) padding granularity


def _round_up(n: int, m: int) -> int:
    return ((n + m - 1) // m) * m


def _padded_nbytes(shape, dtype) -> int:
    """Conservative VMEM footprint of one array (tile-padded last two dims)."""
    itemsize = jnp.dtype(dtype).itemsize
    sub = max(8, 32 // itemsize)          # 8 sublanes for f32, 16 for bf16
    if len(shape) == 0:
        return sub * 128 * itemsize
    if len(shape) == 1:
        return sub * _round_up(int(shape[0]), 128) * itemsize
    lead = 1
    for d in shape[:-2]:
        lead *= int(d)
    return (lead * _round_up(int(shape[-2]), sub)
            * _round_up(int(shape[-1]), 128) * itemsize)


def _vmem_capacity_bytes() -> int:
    """Physical VMEM per TensorCore for the current chip (best effort)."""
    try:
        info = pltpu.get_tpu_info()
        for attr in ("vmem_capacity_bytes", "vmem_bytes", "vmem_capacity"):
            v = getattr(info, attr, None)
            if isinstance(v, int) and v > 0:
                return v
    except Exception:
        pass
    return 64 * 1024 * 1024   # conservative fallback: v7x per-TC VMEM


# --------------------------------------------------------------------------
# Fused kernel: the entire MLP runs in ONE pallas_call; the layer loop is
# unrolled so intermediate activations never leave on-chip memory.
# --------------------------------------------------------------------------
def _fused_mlp_kernel(*refs, meta, final_out_dim):
    """refs = (x_ref, slab_ref, w_ref_0 .. w_ref_{L-1}, o_ref).

    meta: static per-layer tuple (use_bn, act, out_pad, out_dim).
    slab_ref: (L, 3, max_out_pad) f32 — row 0 = bias, 1 = gamma, 2 = beta.
    w_ref_l: (K_l, out_pad_l), f32 or bf16, pre-transposed & lane-padded.
    """
    x_ref, slab_ref = refs[0], refs[1]
    w_refs = refs[2:-1]
    o_ref = refs[-1]

    y = x_ref[...].astype(jnp.float32)              # mirrors x = x.float()
    for l, (use_bn, act, out_pad, _) in enumerate(meta):
        w_ref = w_refs[l]
        slab = slab_ref[l]                           # (3, max_out_pad) f32
        bias = slab[0:1, :out_pad]

        # MXU matmul; bf16 operands with f32 accumulation when weights are bf16.
        xm = y if w_ref.dtype == jnp.float32 else y.astype(w_ref.dtype)
        y = jnp.dot(xm, w_ref[...], preferred_element_type=jnp.float32) + bias

        if use_bn:
            gamma = slab[1:2, :out_pad]
            beta = slab[2:3, :out_pad]
            # Two-pass batch statistics over the (unpadded) real batch rows.
            mean = jnp.mean(y, axis=0, keepdims=True)
            c = y - mean
            var = jnp.mean(c * c, axis=0, keepdims=True)   # biased (PyTorch)
            y = c * jax.lax.rsqrt(var + _BN_EPS) * gamma + beta

        if act == "RELU":
            y = jnp.maximum(y, 0.0)
        elif act == "SIGMOID":
            y = 0.5 * (jnp.tanh(0.5 * y) + 1.0)      # EUP tanh; overflow-safe
        # "LINEAR" -> identity

    # Exact-shape store: no wrapper-side slice.  The store is lane-dense
    # automatically whenever the real out_dim is a multiple of 128.
    o_ref[...] = y[:, :final_out_dim].astype(o_ref.dtype)


# --------------------------------------------------------------------------
# Parameter init (PyTorch layout) and one-time packing (pad + pre-transpose).
# --------------------------------------------------------------------------
def init_params(key, input_dim: int, layer_dims: List[int]):
    """Deterministic synthetic parameters; shapes match nn.Linear/BatchNorm1d."""
    params = []
    in_dim = input_dim
    for out_dim in layer_dims:
        key, kw, kb = jax.random.split(key, 3)
        params.append({
            "w": jax.random.normal(kw, (out_dim, in_dim), jnp.float32) * 0.1,
            "b": jax.random.normal(kb, (out_dim,), jnp.float32) * 0.1,
            "gamma": jnp.ones((out_dim,), jnp.float32),   # BatchNorm1d weight
            "beta": jnp.zeros((out_dim,), jnp.float32),   # BatchNorm1d bias
        })
        in_dim = out_dim
    return params


def pack_model_params(input_dim, layer_dims, layer_batch_norms, layer_acts,
                      params, weight_dtype=jnp.float32):
    """One-time packing:
       * weights transposed to (in, out), feature dims zero-padded to 128,
         optionally cast to bf16 (MXU-native on v6e/v7x),
       * every layer's (bias, gamma, beta) stacked into a single
         (L, 3, max_out_pad) slab so the whole net needs only 2 + L inputs.
    Returns (weights_list, slab_stack, meta)."""
    n_layers = len(layer_dims)
    out_pads = [_round_up(d, _LANE) for d in layer_dims]
    max_pad = max(out_pads)

    weights = []
    slabs = jnp.zeros((n_layers, 3, max_pad), jnp.float32)
    meta = []
    k_real = input_dim          # first layer keeps K exact: x is passed unpadded
    k_pad = input_dim
    for l, (p, out_dim, use_bn, act) in enumerate(
            zip(params, layer_dims, layer_batch_norms, layer_acts)):
        act_u = act.upper()
        if act_u not in ("RELU", "SIGMOID", "LINEAR"):
            raise ValueError("Un-defined activation type %s" % act_u)
        out_pad = out_pads[l]

        w_t = jnp.zeros((k_pad, out_pad), jnp.float32)
        w_t = w_t.at[:k_real, :out_dim].set(p["w"].T).astype(weight_dtype)
        weights.append(w_t)

        slabs = slabs.at[l, 0, :out_dim].set(p["b"])
        slabs = slabs.at[l, 1, :out_dim].set(p["gamma"])
        slabs = slabs.at[l, 2, :out_dim].set(p["beta"])

        meta.append((bool(use_bn), act_u, int(out_pad), int(out_dim)))
        k_real, k_pad = out_dim, out_pad

    return weights, slabs, tuple(meta)


# --------------------------------------------------------------------------
# Forward wrapper: one pallas_call for the whole network, full-array blocks.
# --------------------------------------------------------------------------
def make_fused_forward(input_dim, layer_dims):
    final_out_dim = int(layer_dims[-1])
    vmem_cap = _vmem_capacity_bytes()        # per-generation physical VMEM

    def forward(x, weights, slabs, meta):
        batch = x.shape[0]
        kernel = functools.partial(_fused_mlp_kernel, meta=meta,
                                   final_out_dim=final_out_dim)
        inputs = [x, slabs] + list(weights)

        def full_spec(shape):
            nd = len(shape)
            return pl.BlockSpec(tuple(shape), lambda *_, _nd=nd: (0,) * _nd)

        in_specs = [full_spec(a.shape) for a in inputs]
        out_spec = full_spec((batch, final_out_dim))

        # Advisory cost estimate so XLA can schedule surrounding ops.
        flops, trans = 0, 0
        k = input_dim
        for use_bn, act, _, out_dim in meta:
            flops += 2 * batch * k * out_dim
            if act == "SIGMOID":
                trans += batch * out_dim
            if use_bn:
                trans += out_dim            # one rsqrt per feature column
            k = out_dim
        bytes_accessed = sum(int(a.size) * a.dtype.itemsize for a in inputs)
        bytes_accessed += batch * final_out_dim * 4
        cost = pl.CostEstimate(flops=int(flops), transcendentals=int(trans),
                               bytes_accessed=int(bytes_accessed))

        # Per-generation VMEM budget: padded inputs + output + live activation.
        footprint = sum(_padded_nbytes(a.shape, a.dtype) for a in inputs)
        footprint += _padded_nbytes((batch, final_out_dim), jnp.float32)
        max_feat = max(m[2] for m in meta)
        footprint += 2 * _padded_nbytes((batch, max_feat), jnp.float32)
        needed = 2 * footprint + (4 << 20)
        if needed > int(0.9 * vmem_cap):
            # TODO(synk): layer-streamed fallback (grid over layer index with
            # double-buffered weight DMA) for nets that exceed VMEM (v7x first).
            raise NotImplementedError(
                "weights do not fit VMEM; layer-streamed path not implemented")
        vmem_limit = min(int(0.9 * vmem_cap), max(needed, 16 << 20))

        return pl.pallas_call(
            kernel,
            out_shape=jax.ShapeDtypeStruct((batch, final_out_dim), jnp.float32),
            in_specs=in_specs,
            out_specs=out_spec,
            cost_estimate=cost,
            compiler_params=pltpu.CompilerParams(vmem_limit_bytes=vmem_limit),
        )(*inputs)

    # meta (python bools/strs/ints) must be static under jit.
    return jax.jit(forward, static_argnums=(3,))


# --------------------------------------------------------------------------
# Pure-JAX reference (PyTorch training-mode semantics) for sanity checking.
# --------------------------------------------------------------------------
def _reference_forward(x, params, layer_batch_norms, layer_acts,
                       weight_dtype=jnp.float32):
    """With weight_dtype=bf16 the matmul operands are rounded to bf16
    (accumulation stays f32) to mirror the kernel's MXU path."""
    x = x.astype(jnp.float32)
    for p, use_bn, act in zip(params, layer_batch_norms, layer_acts):
        w = p["w"].astype(jnp.float32)
        xm = x
        if weight_dtype != jnp.float32:
            w = w.astype(weight_dtype).astype(jnp.float32)
            xm = x.astype(weight_dtype).astype(jnp.float32)
        y = xm @ w.T + p["b"]
        if use_bn:
            mean = jnp.mean(y, axis=0, keepdims=True)
            var = jnp.mean((y - mean) ** 2, axis=0, keepdims=True)
            y = (y - mean) / jnp.sqrt(var + _BN_EPS) * p["gamma"] + p["beta"]
        a = act.upper()
        if a == "RELU":
            y = jnp.maximum(y, 0.0)
        elif a == "SIGMOID":
            y = jax.nn.sigmoid(y)
        x = y
    return x


if __name__ == "__main__":
    key = jax.random.PRNGKey(0)
    key, kx, kp = jax.random.split(key, 3)

    batch = 8
    input_dim = 32
    layer_dims = [64, 32, 16]
    layer_batch_norms = [True, False, True]
    layer_acts = ["relu", "sigmoid", "linear"]

    x = jax.random.normal(kx, (batch, input_dim), jnp.float32)
    params = init_params(kp, input_dim, layer_dims)
    forward = make_fused_forward(input_dim, layer_dims)

    # --- f32-weight path: tight check against the exact reference -----------
    weights, slabs, meta = pack_model_params(
        input_dim, layer_dims, layer_batch_norms, layer_acts, params,
        weight_dtype=jnp.float32)
    out = jax.block_until_ready(forward(x, weights, slabs, meta))
    ref = _reference_forward(x, params, layer_batch_norms, layer_acts)
    assert out.shape == (batch, layer_dims[-1])
    assert bool(jnp.allclose(out, ref, atol=1e-4, rtol=1e-4)), \
        float(jnp.max(jnp.abs(out - ref)))

    # --- bf16-weight path (MXU-native on v6e/v7x): checked against a
    #     reference that rounds the matmul operands to bf16 the same way -----
    weights_bf, slabs_bf, meta_bf = pack_model_params(
        input_dim, layer_dims, layer_batch_norms, layer_acts, params,
        weight_dtype=jnp.bfloat16)
    out_bf = jax.block_until_ready(forward(x, weights_bf, slabs_bf, meta_bf))
    ref_bf = _reference_forward(x, params, layer_batch_norms, layer_acts,
                                weight_dtype=jnp.bfloat16)
    assert bool(jnp.all(jnp.isfinite(out_bf)))
    assert bool(jnp.allclose(out_bf, ref_bf, atol=5e-3, rtol=5e-3)), \
        float(jnp.max(jnp.abs(out_bf - ref_bf)))

    print("KERNEL_OK")
</pallas_src>

<mosaic_0001>
module attributes {stable_mosaic.version = 11 : i64} {
  func.func @_fused_mlp_kernel(%arg0: memref<8x32xf32, #tpu.memory_space<vmem>>, %arg1: memref<3x3x128xf32, #tpu.memory_space<vmem>>, %arg2: memref<32x128xf32, #tpu.memory_space<vmem>>, %arg3: memref<128x128xf32, #tpu.memory_space<vmem>>, %arg4: memref<128x128xf32, #tpu.memory_space<vmem>>, %arg5: memref<8x16xf32, #tpu.memory_space<vmem>>) attributes {dimension_semantics = [], scalar_prefetch = 0 : i64, scratch_operands = 0 : i64, tpu.core_type = #tpu.core_type<tc>} {
    %c0 = arith.constant 0 : index
    %c0_0 = arith.constant 0 : index
    %0 = vector.load %arg0[%c0, %c0_0] : memref<8x32xf32, #tpu.memory_space<vmem>>, vector<8x32xf32>
    %c0_1 = arith.constant 0 : index
    %c0_2 = arith.constant 0 : index
    %c0_3 = arith.constant 0 : index
    %1 = vector.load %arg1[%c0_1, %c0_2, %c0_3] : memref<3x3x128xf32, #tpu.memory_space<vmem>>, vector<1x3x128xf32>
    %2 = vector.shape_cast %1 : vector<1x3x128xf32> to vector<3x128xf32>
    %3 = vector.extract_strided_slice %2 {offsets = [0, 0], sizes = [1, 128], strides = [1, 1]} : vector<3x128xf32> to vector<1x128xf32>
    %c0_4 = arith.constant 0 : index
    %c0_5 = arith.constant 0 : index
    %4 = vector.load %arg2[%c0_4, %c0_5] : memref<32x128xf32, #tpu.memory_space<vmem>>, vector<32x128xf32>
    %cst = arith.constant dense<0.000000e+00> : vector<8x128xf32>
    %5 = tpu.matmul %0, %4, %cst {dimension_numbers = #tpu.dot_dimension_numbers<[1], [0], [0], [1], [0, 0, 1, 1], [], []>} : vector<8x32xf32>, vector<32x128xf32>, vector<8x128xf32> -> vector<8x128xf32>
    %6 = vector.broadcast %3 : vector<1x128xf32> to vector<8x128xf32>
    %7 = arith.addf %5, %6 : vector<8x128xf32>
    %8 = vector.extract_strided_slice %2 {offsets = [1, 0], sizes = [1, 128], strides = [1, 1]} : vector<3x128xf32> to vector<1x128xf32>
    %9 = vector.extract_strided_slice %2 {offsets = [2, 0], sizes = [1, 128], strides = [1, 1]} : vector<3x128xf32> to vector<1x128xf32>
    %cst_6 = arith.constant dense<0.000000e+00> : vector<128xf32>
    %10 = vector.multi_reduction <add>, %7, %cst_6 [0] : vector<8x128xf32> to vector<128xf32>
    %11 = vector.shape_cast %10 : vector<128xf32> to vector<1x128xf32>
    %cst_7 = arith.constant 8.000000e+00 : f32
    %12 = vector.broadcast %cst_7 : f32 to vector<1x128xf32>
    %13 = arith.divf %11, %12 : vector<1x128xf32>
    %14 = vector.broadcast %13 : vector<1x128xf32> to vector<8x128xf32>
    %15 = arith.subf %7, %14 : vector<8x128xf32>
    %16 = arith.mulf %15, %15 : vector<8x128xf32>
    %cst_8 = arith.constant dense<0.000000e+00> : vector<128xf32>
    %17 = vector.multi_reduction <add>, %16, %cst_8 [0] : vector<8x128xf32> to vector<128xf32>
    %18 = vector.shape_cast %17 : vector<128xf32> to vector<1x128xf32>
    %cst_9 = arith.constant 8.000000e+00 : f32
    %19 = vector.broadcast %cst_9 : f32 to vector<1x128xf32>
    %20 = arith.divf %18, %19 : vector<1x128xf32>
    %cst_10 = arith.constant 9.99999974E-6 : f32
    %21 = vector.broadcast %cst_10 : f32 to vector<1x128xf32>
    %22 = arith.addf %20, %21 : vector<1x128xf32>
    %23 = math.rsqrt %22 : vector<1x128xf32>
    %24 = vector.broadcast %23 : vector<1x128xf32> to vector<8x128xf32>
    %25 = arith.mulf %15, %24 : vector<8x128xf32>
    %26 = vector.broadcast %8 : vector<1x128xf32> to vector<8x128xf32>
    %27 = arith.mulf %25, %26 : vector<8x128xf32>
    %28 = vector.broadcast %9 : vector<1x128xf32> to vector<8x128xf32>
    %29 = arith.addf %27, %28 : vector<8x128xf32>
    %cst_11 = arith.constant 0.000000e+00 : f32
    %30 = vector.broadcast %cst_11 : f32 to vector<8x128xf32>
    %31 = arith.maximumf %29, %30 : vector<8x128xf32>
    %c1 = arith.constant 1 : index
    %c0_12 = arith.constant 0 : index
    %c0_13 = arith.constant 0 : index
    %32 = vector.load %arg1[%c1, %c0_12, %c0_13] : memref<3x3x128xf32, #tpu.memory_space<vmem>>, vector<1x3x128xf32>
    %33 = vector.shape_cast %32 : vector<1x3x128xf32> to vector<3x128xf32>
    %34 = vector.extract_strided_slice %33 {offsets = [0, 0], sizes = [1, 128], strides = [1, 1]} : vector<3x128xf32> to vector<1x128xf32>
    %c0_14 = arith.constant 0 : index
    %c0_15 = arith.constant 0 : index
    %35 = vector.load %arg3[%c0_14, %c0_15] : memref<128x128xf32, #tpu.memory_space<vmem>>, vector<128x128xf32>
    %cst_16 = arith.constant dense<0.000000e+00> : vector<8x128xf32>
    %36 = tpu.matmul %31, %35, %cst_16 {dimension_numbers = #tpu.dot_dimension_numbers<[1], [0], [0], [1], [0, 0, 1, 1], [], []>} : vector<8x128xf32>, vector<128x128xf32>, vector<8x128xf32> -> vector<8x128xf32>
    %37 = vector.broadcast %34 : vector<1x128xf32> to vector<8x128xf32>
    %38 = arith.addf %36, %37 : vector<8x128xf32>
    %cst_17 = arith.constant 5.000000e-01 : f32
    %39 = vector.broadcast %cst_17 : f32 to vector<8x128xf32>
    %40 = arith.mulf %39, %38 : vector<8x128xf32>
    %41 = math.tanh %40 : vector<8x128xf32>
    %cst_18 = arith.constant 1.000000e+00 : f32
    %42 = vector.broadcast %cst_18 : f32 to vector<8x128xf32>
    %43 = arith.addf %41, %42 : vector<8x128xf32>
    %cst_19 = arith.constant 5.000000e-01 : f32
    %44 = vector.broadcast %cst_19 : f32 to vector<8x128xf32>
    %45 = arith.mulf %44, %43 : vector<8x128xf32>
    %c2 = arith.constant 2 : index
    %c0_20 = arith.constant 0 : index
    %c0_21 = arith.constant 0 : index
    %46 = vector.load %arg1[%c2, %c0_20, %c0_21] : memref<3x3x128xf32, #tpu.memory_space<vmem>>, vector<1x3x128xf32>
    %47 = vector.shape_cast %46 : vector<1x3x128xf32> to vector<3x128xf32>
    %48 = vector.extract_strided_slice %47 {offsets = [0, 0], sizes = [1, 128], strides = [1, 1]} : vector<3x128xf32> to vector<1x128xf32>
    %c0_22 = arith.constant 0 : index
    %c0_23 = arith.constant 0 : index
    %49 = vector.load %arg4[%c0_22, %c0_23] : memref<128x128xf32, #tpu.memory_space<vmem>>, vector<128x128xf32>
    %cst_24 = arith.constant dense<0.000000e+00> : vector<8x128xf32>
    %50 = tpu.matmul %45, %49, %cst_24 {dimension_numbers = #tpu.dot_dimension_numbers<[1], [0], [0], [1], [0, 0, 1, 1], [], []>} : vector<8x128xf32>, vector<128x128xf32>, vector<8x128xf32> -> vector<8x128xf32>
    %51 = vector.broadcast %48 : vector<1x128xf32> to vector<8x128xf32>
    %52 = arith.addf %50, %51 : vector<8x128xf32>
    %53 = vector.extract_strided_slice %47 {offsets = [1, 0], sizes = [1, 128], strides = [1, 1]} : vector<3x128xf32> to vector<1x128xf32>
    %54 = vector.extract_strided_slice %47 {offsets = [2, 0], sizes = [1, 128], strides = [1, 1]} : vector<3x128xf32> to vector<1x128xf32>
    %cst_25 = arith.constant dense<0.000000e+00> : vector<128xf32>
    %55 = vector.multi_reduction <add>, %52, %cst_25 [0] : vector<8x128xf32> to vector<128xf32>
    %56 = vector.shape_cast %55 : vector<128xf32> to vector<1x128xf32>
    %cst_26 = arith.constant 8.000000e+00 : f32
    %57 = vector.broadcast %cst_26 : f32 to vector<1x128xf32>
    %58 = arith.divf %56, %57 : vector<1x128xf32>
    %59 = vector.broadcast %58 : vector<1x128xf32> to vector<8x128xf32>
    %60 = arith.subf %52, %59 : vector<8x128xf32>
    %61 = arith.mulf %60, %60 : vector<8x128xf32>
    %cst_27 = arith.constant dense<0.000000e+00> : vector<128xf32>
    %62 = vector.multi_reduction <add>, %61, %cst_27 [0] : vector<8x128xf32> to vector<128xf32>
    %63 = vector.shape_cast %62 : vector<128xf32> to vector<1x128xf32>
    %cst_28 = arith.constant 8.000000e+00 : f32
    %64 = vector.broadcast %cst_28 : f32 to vector<1x128xf32>
    %65 = arith.divf %63, %64 : vector<1x128xf32>
    %cst_29 = arith.constant 9.99999974E-6 : f32
    %66 = vector.broadcast %cst_29 : f32 to vector<1x128xf32>
    %67 = arith.addf %65, %66 : vector<1x128xf32>
    %68 = math.rsqrt %67 : vector<1x128xf32>
    %69 = vector.broadcast %68 : vector<1x128xf32> to vector<8x128xf32>
    %70 = arith.mulf %60, %69 : vector<8x128xf32>
    %71 = vector.broadcast %53 : vector<1x128xf32> to vector<8x128xf32>
    %72 = arith.mulf %70, %71 : vector<8x128xf32>
    %73 = vector.broadcast %54 : vector<1x128xf32> to vector<8x128xf32>
    %74 = arith.addf %72, %73 : vector<8x128xf32>
    %75 = vector.extract_strided_slice %74 {offsets = [0, 0], sizes = [8, 16], strides = [1, 1]} : vector<8x128xf32> to vector<8x16xf32>
    %c0_30 = arith.constant 0 : index
    %c0_31 = arith.constant 0 : index
    %76 = vector.load %arg5[%c0_30, %c0_31] : memref<8x16xf32, #tpu.memory_space<vmem>>, vector<8x16xf32>
    tpu.vector_store %arg5[%c0_30, %c0_31], %75 {strides = array<i32>} : memref<8x16xf32, #tpu.memory_space<vmem>>, vector<8x16xf32>,
    return
  }
}

</mosaic_0001>

<bundles_post_ra>
// kernel: forward.1
= control target key start
LH: loop header
LB: loop body
LE: loop exit
PB: predicated region body
PF: predicated region fallthrough
CT: control target
= control target key end

     0   :  { %10 = vsyncpa [#allocation3], 0  ;;  %s893_s0 = inlined_call_operand.hbm [shape: f32[8,32], index: 0, kind: input, shape index: {}]   ;;  %s894_s1 = inlined_call_operand.vmem [shape: f32[3,3,128], index: 1, kind: input, shape index: {}]   ;;  %s895_s2 = inlined_call_operand.hbm [shape: f32[32,128], index: 2, kind: input, shape index: {}]   ;;  %s896_s3 = inlined_call_operand.hbm [shape: f32[128,128], index: 3, kind: input, shape index: {}]   ;;  %s897_s4 = inlined_call_operand.hbm [shape: f32[128,128], index: 4, kind: input, shape index: {}]   ;;  %s898_s5 = inlined_call_operand.hbm [shape: f32[8,16], index: 5, kind: output, shape index: {}]  }
   0x1   :  { %11 = vsyncpa [#allocation6], 0 }
   0x2   :  { %12 = vsyncpa [#allocation9], 0 }
   0x3   :  { %13 = vsyncpa [#allocation4], 0  ;;  %s736_s18 = smov [#allocation5]   ;;  %s618_s22 = scalar_lea.hbm %s895_s2, 512 }
   0x4   :  { %s31_s19 = sshll.u32 %s736_s18, 4  ;;  %p619_p0 = scmp.ne.s32.totalorder %s895_s2, %s618_s22  ;;  %s32_s19 = int_to_ptr.vmem [resolvable:$true] %s31_s19 }
   0x5   :  { %p622_p1 = scmp.lt.u32.totalorder %s618_s22, %s895_s2 }
   0x7   :  { %p624_p2 = pnand %p622_p1, %p619_p0 }
   0x9   :  { %627 = shalt.err (!%p624_p2)
}
   0xa   :  { %s628_s27 = scalar_lea.vmem %s32_s19, 512  ;;  %p633_p4 = scmp.lt.s32.totalorder %s32_s19, %s32_s19 }
   0xb   :  { %p629_p3 = scmp.ne.s32.totalorder %s32_s19, %s628_s27  ;;  %p634_p5 = scmp.lt.s32.totalorder %s628_s27, %s628_s27 }
   0xd   :  { %p635_p6 = por %p634_p5, %p633_p4 }
   0xf   :  { %p636_p7 = pnand %p635_p6, %p629_p3 }
  0x11   :  { %639 = shalt.err (!%p636_p7)
}
  0x12   :  { %s737_s28 = smov 128   ;;  %s738_s29 = smov 8  }
  0x13   :  { %37 = dma.hbm_to_vmem [thread:$0]  %s895_s2, 512, %s32_s19, [#allocation6], %s737_s28, %s737_s28, %s738_s29  }
  0x14   :  { %s739_s7 = smov [#allocation2]   ;;  %s740_s9 = smov [#allocation7]  }
  0x15   :  { %s20_s8 = sshll.u32 %s739_s7, 4  ;;  %s43_s10 = sshll.u32 %s740_s9, 4  ;;  %s21_s8 = int_to_ptr.vmem [resolvable:$true] %s20_s8  ;;  %s44_s10 = int_to_ptr.vmem [resolvable:$true] %s43_s10 }
  0x16   :  { %s640_s13 = scalar_lea.hbm %s893_s0, 128 }
  0x17   :  { %p641_p8 = scmp.ne.s32.totalorder %s893_s0, %s640_s13  ;;  %p644_p9 = scmp.lt.u32.totalorder %s640_s13, %s893_s0 }
  0x19   :  { %p646_p10 = pnand %p644_p9, %p641_p8 }
  0x1b   :  { %649 = shalt.err (!%p646_p10)
}
  0x1c   :  { %s650_s2 = scalar_lea.vmem %s21_s8, 128  ;;  %p655_p12 = scmp.lt.s32.totalorder %s21_s8, %s21_s8 }
  0x1d   :  { %p651_p11 = scmp.ne.s32.totalorder %s21_s8, %s650_s2  ;;  %p656_p13 = scmp.lt.s32.totalorder %s650_s2, %s650_s2 }
  0x1f   :  { %p657_p0 = por %p656_p13, %p655_p12 }
  0x21   :  { %p658_p1 = pnand %p657_p0, %p651_p11 }
  0x23   :  { %661 = shalt.err (!%p658_p1)
}
  0x24   :  { %23 = dma.hbm_to_vmem [thread:$0]  %s893_s0, 128, %s21_s8, [#allocation3]  }
  0x25   :  { %s662_s22 = scalar_lea.hbm %s896_s3, 2048 }
  0x26   :  { %p663_p2 = scmp.ne.s32.totalorder %s896_s3, %s662_s22  ;;  %p666_p3 = scmp.lt.u32.totalorder %s662_s22, %s896_s3 }
  0x28   :  { %p668_p4 = pnand %p666_p3, %p663_p2 }
  0x2a   :  { %671 = shalt.err (!%p668_p4)
}
  0x2b   :  { %s672_s27 = scalar_lea.vmem %s44_s10, 2048  ;;  %p677_p6 = scmp.lt.s32.totalorder %s44_s10, %s44_s10 }
  0x2c   :  { %p673_p5 = scmp.ne.s32.totalorder %s44_s10, %s672_s27  ;;  %p678_p7 = scmp.lt.s32.totalorder %s672_s27, %s672_s27 }
  0x2e   :  { %p679_p8 = por %p678_p7, %p677_p6 }
  0x30   :  { %p680_p9 = pnand %p679_p8, %p673_p5 }
  0x32   :  { %683 = shalt.err (!%p680_p9)
}
  0x33   :  { %49 = dma.hbm_to_vmem [thread:$0]  %s896_s3, 2048, %s44_s10, [#allocation6], %s737_s28, %s737_s28, %s738_s29  }
  0x34   :  { %s741_s6 = smov [#allocation8]   ;;  %s684_s11 = scalar_lea.hbm %s897_s4, 2048 }
  0x35   :  { %s55_s7 = sshll.u32 %s741_s6, 4  ;;  %p685_p10 = scmp.ne.s32.totalorder %s897_s4, %s684_s11  ;;  %s56_s7 = int_to_ptr.vmem [resolvable:$true] %s55_s7 }
  0x36   :  { %p688_p11 = scmp.lt.u32.totalorder %s684_s11, %s897_s4 }
  0x38   :  { %p690_p12 = pnand %p688_p11, %p685_p10 }
  0x3a   :  { %693 = shalt.err (!%p690_p12)
}
  0x3b   :  { %s694_s16 = scalar_lea.vmem %s56_s7, 2048  ;;  %p699_p0 = scmp.lt.s32.totalorder %s56_s7, %s56_s7 }
  0x3c   :  { %p695_p13 = scmp.ne.s32.totalorder %s56_s7, %s694_s16  ;;  %p700_p1 = scmp.lt.s32.totalorder %s694_s16, %s694_s16 }
  0x3e   :  { %p701_p2 = por %p700_p1, %p699_p0 }
  0x40   :  { %p702_p3 = pnand %p701_p2, %p695_p13 }
  0x42   :  { %705 = shalt.err (!%p702_p3)
}
  0x43   :  { %61 = dma.hbm_to_vmem [thread:$0]  %s897_s4, 2048, %s56_s7, [#allocation9], %s737_s28, %s737_s28, %s738_s29  }
  0x44   :  { %728 = dma.done.wait [#allocation3], 128  }
  0x45   :  { %729 = vsyncadd [#allocation3], 4294967168 }
  0x46   :  { %730 = dma.done.wait [#allocation6], 2560  }
  0x47   :  { %731 = vsyncadd [#allocation6], 4294964736 }
  0x48   :  { %732 = dma.done.wait [#allocation9], 2048  }
  0x49   :  { %733 = vsyncadd [#allocation9], 4294965248  ;;  %v742_v0 = vmov 0.0|0.0   ;;  %vm743_vm0 = vmmov 0   ;;  %v744_v1 = vmov 0.0   ;;  %v76_v2 = vld [vmem:[#allocation5] sm:$0xff]  ;;  %v80_v42 = vlaneseq }
  0x4a   :  { %548 = vmatprep.subr.bf16.mxu0 %v742_v0  ;;  %475 = vmatprep.mubr.msk.f32.mxu0 %vm743_vm0, %v744_v1  ;;  %v77_v3 = vld [vmem:[#allocation5 + $0x8] sm:$0xff]  ;;  %v78_v4 = vld [vmem:[#allocation5 + $0x10] sm:$0xff]  ;;  %v79_v6 = vld [vmem:[#allocation5 + $0x18] sm:$0xff]  ;;  %vm84_vm1 = vcmask 261120   ;;  %vm406_vm2 = vcmask 130048  }
  0x4b   :  { %554 = vmatprep.subr.bf16.mxu1 %v742_v0  ;;  %510 = vmatprep.mubr.msk.f32.mxu1 %vm743_vm0, %v744_v1  ;;  %v549_v5 = vpack.c.bf16 %v77_v3, %v76_v2  ;;  %v552_v7 = vpack.c.bf16 %v79_v6, %v78_v4  ;;  %v74_v8 = vld [vmem:[#allocation2] sm:$0xff]  ;;  %v191_v9 = vld [vmem:[#allocation7] sm:$0xff]  ;;  %v192_v10 = vld [vmem:[#allocation7 + $0x8] sm:$0xff]  ;;  %v850_v43 = vshrl.u32 %v80_v42, 7 }
  0x4c   :  { %v555_v11 = vpack.c.bf16 %v192_v10, %v191_v9  ;;  %v193_v12 = vld [vmem:[#allocation7 + $0x10] sm:$0xff]  ;;  %v194_v13 = vld [vmem:[#allocation7 + $0x18] sm:$0xff]  ;;  %v195_v15 = vld [vmem:[#allocation7 + $0x20] sm:$0xff] }
  0x4d   :  { %550 = vmatpush3.bf16.msra.mxu0 %v549_v5  ;;  %v558_v14 = vpack.c.bf16 %v194_v13, %v193_v12  ;;  %v196_v16 = vld [vmem:[#allocation7 + $0x28] sm:$0xff]  ;;  %v197_v18 = vld [vmem:[#allocation7 + $0x30] sm:$0xff]  ;;  %v198_v19 = vld [vmem:[#allocation7 + $0x38] sm:$0xff]  ;;  %v853_v44 = vsub.s32 0, %v850_v43  ;;  %v180_v4 = vsub.s32 1, %v850_v43  ;;  %v185_v5 = vsub.s32 2, %v850_v43 }
  0x4e   :  { %551 = vmatprep.subr.bf16.mxu0 %v742_v0  ;;  %556 = vmatpush3.bf16.msra.mxu1 %v555_v11  ;;  %v561_v17 = vpack.c.bf16 %v196_v16, %v195_v15  ;;  %v564_v20 = vpack.c.bf16 %v198_v19, %v197_v18  ;;  %v199_v21 = vld [vmem:[#allocation7 + $0x40] sm:$0xff]  ;;  %v200_v22 = vld [vmem:[#allocation7 + $0x48] sm:$0xff]  ;;  %v201_v24 = vld [vmem:[#allocation7 + $0x50] sm:$0xff] }
  0x4f   :  { %557 = vmatprep.subr.bf16.mxu1 %v742_v0  ;;  %v567_v23 = vpack.c.bf16 %v200_v22, %v199_v21  ;;  %v202_v25 = vld [vmem:[#allocation7 + $0x58] sm:$0xff]  ;;  %v203_v27 = vld [vmem:[#allocation7 + $0x60] sm:$0xff]  ;;  %v204_v28 = vld [vmem:[#allocation7 + $0x68] sm:$0xff] }
  0x50   :  { %v570_v26 = vpack.c.bf16 %v202_v25, %v201_v24  ;;  %v573_v29 = vpack.c.bf16 %v204_v28, %v203_v27  ;;  %v205_v30 = vld [vmem:[#allocation7 + $0x70] sm:$0xff]  ;;  %v206_v31 = vld [vmem:[#allocation7 + $0x78] sm:$0xff]  ;;  %v287_v33 = vld [vmem:[#allocation8] sm:$0xff] }
  0x51   :  { %553 = vmatpush3.bf16.msra.mxu0 %v552_v7  ;;  %v576_v32 = vpack.c.bf16 %v206_v31, %v205_v30  ;;  %v288_v34 = vld [vmem:[#allocation8 + $0x8] sm:$0xff]  ;;  %v289_v35 = vld [vmem:[#allocation8 + $0x10] sm:$0xff]  ;;  %v290_v37 = vld [vmem:[#allocation8 + $0x18] sm:$0xff] }
  0x52   :  { %578 = vmatprep.subr.bf16.mxu0 %v742_v0  ;;  %559 = vmatpush3.bf16.msra.mxu1 %v558_v14  ;;  %v579_v36 = vpack.c.bf16 %v288_v34, %v287_v33  ;;  %v582_v38 = vpack.c.bf16 %v290_v37, %v289_v35  ;;  %v291_v39 = vld [vmem:[#allocation8 + $0x20] sm:$0xff]  ;;  %v292_v40 = vld [vmem:[#allocation8 + $0x28] sm:$0xff]  ;;  %v293_v13 = vld [vmem:[#allocation8 + $0x30] sm:$0xff] }
  0x53   :  { %560 = vmatprep.subr.bf16.mxu1 %v742_v0  ;;  %v585_v41 = vpack.c.bf16 %v292_v40, %v291_v39  ;;  %v75_v45 = vld [vmem:[%s894_s1] sm:$0x7]  ;;  %v294_v14 = vld [vmem:[#allocation8 + $0x38] sm:$0xff]  ;;  %v295_v16 = vld [vmem:[#allocation8 + $0x40] sm:$0xff] }
  0x54   :  { %476 = vmatmul.mubr.msk.f32.vlgmr.msra.gmra.mrb[0].mxu0 %vm84_vm1, %v74_v8  ;;  %v83_v46 = vrot.slane %v75_v45, %v853_v44  ;;  %v181_v6 = vrot.slane %v75_v45, %v180_v4  ;;  %v186_v9 = vrot.slane %v75_v45, %v185_v5  ;;  %v588_v15 = vpack.c.bf16 %v294_v14, %v293_v13  ;;  %v297_v19 = vld [vmem:[#allocation8 + $0x50] sm:$0xff]  ;;  %v299_v22 = vld [vmem:[#allocation8 + $0x60] sm:$0xff]  ;;  %v426_v28 = vld [vmem:[%s894_s1 + $0x4] sm:$0x7] }
  0x55   :  { %545 = vmatprep.mubr.msk.f32.mxu0 %vm743_vm0, %v744_v1  ;;  %580 = vmatpush3.bf16.msra.mxu0 %v579_v36  ;;  %v301_v25 = vld [vmem:[#allocation8 + $0x70] sm:$0xff] }
  0x56   :  { %562 = vmatpush3.bf16.msra.mxu1 %v561_v17  ;;  %581 = vmatprep.subr.bf16.mxu0 %v742_v0  ;;  %v296_v17 = vld [vmem:[#allocation8 + $0x48] sm:$0xff] }
  0x57   :  { %563 = vmatprep.subr.bf16.mxu1 %v742_v0  ;;  %v591_v18 = vpack.c.bf16 %v296_v17, %v295_v16 }
  0x59   :  { %583 = vmatpush3.bf16.msra.mxu0 %v582_v38 }
  0x5a   :  { %565 = vmatpush3.bf16.msra.mxu1 %v564_v20  ;;  %584 = vmatprep.subr.bf16.mxu0 %v742_v0  ;;  %v298_v20 = vld [vmem:[#allocation8 + $0x58] sm:$0xff] }
  0x5b   :  { %566 = vmatprep.subr.bf16.mxu1 %v742_v0  ;;  %v594_v21 = vpack.c.bf16 %v298_v20, %v297_v19 }
  0x5d   :  { %586 = vmatpush3.bf16.msra.mxu0 %v585_v41 }
  0x5e   :  { %568 = vmatpush3.bf16.msra.mxu1 %v567_v23  ;;  %587 = vmatprep.subr.bf16.mxu0 %v742_v0  ;;  %v300_v23 = vld [vmem:[#allocation8 + $0x68] sm:$0xff] }
  0x5f   :  { %569 = vmatprep.subr.bf16.mxu1 %v742_v0  ;;  %v597_v24 = vpack.c.bf16 %v300_v23, %v299_v22 }
  0x61   :  { %589 = vmatpush3.bf16.msra.mxu0 %v588_v15 }
  0x62   :  { %571 = vmatpush3.bf16.msra.mxu1 %v570_v26  ;;  %590 = vmatprep.subr.bf16.mxu0 %v742_v0  ;;  %v302_v26 = vld [vmem:[#allocation8 + $0x78] sm:$0xff] }
  0x63   :  { %572 = vmatprep.subr.bf16.mxu1 %v742_v0  ;;  %v600_v27 = vpack.c.bf16 %v302_v26, %v301_v25 }
  0x65   :  { %592 = vmatpush3.bf16.msra.mxu0 %v591_v18 }
  0x66   :  { %574 = vmatpush3.bf16.msra.mxu1 %v573_v29  ;;  %593 = vmatprep.subr.bf16.mxu0 %v742_v0  ;;  %v210_v29 = vrot.slane %v426_v28, %v853_v44 }
  0x67   :  { %575 = vmatprep.subr.bf16.mxu1 %v742_v0 }
  0x69   :  { %595 = vmatpush3.bf16.msra.mxu0 %v594_v21 }
  0x6a   :  { %577 = vmatpush3.bf16.msra.mxu1 %v576_v32  ;;  %596 = vmatprep.subr.bf16.mxu0 %v742_v0 }
  0x6d   :  { %598 = vmatpush3.bf16.msra.mxu0 %v597_v24 }
  0x6e   :  { %599 = vmatprep.subr.bf16.mxu0 %v742_v0  ;;  %v427_v0 = vld [vmem:[%s894_s1 + $0x8] sm:$0x7]  ;;  %s745_s1 = smov [#allocation10]  }
  0x6f   :  { %v306_v37 = vrot.slane %v427_v0, %v853_v44  ;;  %s414_s19 = sshll.u32 %s745_s1, 4  ;;  %s415_s19 = int_to_ptr.vmem [resolvable:$true] %s414_s19 }
  0x70   :  { %s706_s20 = scalar_lea.vmem %s415_s19, 128  ;;  %p711_p5 = scmp.lt.s32.totalorder %s415_s19, %s415_s19 }
  0x71   :  { %601 = vmatpush3.bf16.msra.mxu0 %v600_v27  ;;  %p707_p4 = scmp.ne.s32.totalorder %s415_s19, %s706_s20  ;;  %p712_p6 = scmp.lt.s32.totalorder %s706_s20, %s706_s20 }
  0x73   :  { %p713_p7 = por %p712_p6, %p711_p5 }
  0x75   :  { %p714_p8 = pnand %p713_p7, %p707_p4 }
 0x127   :  { %v154_v47 = vpop.f32.mrb[0].mxu0 }
 0x128   :  { %v155_v48 = vadd.f32 %v154_v47, %v83_v46  ;;  %v477_v49 = vpop.f32.mrb[1].mxu0 }
 0x12a   :  { %v158_v50 = vrot.slane %v155_v48, 4 }
 0x12c   :  { %v159_v51 = vadd.f32 %v158_v50, %v155_v48 }
 0x12e   :  { %v160_v52 = vrot.slane %v159_v51, 2 }
 0x130   :  { %v161_v53 = vadd.f32 %v160_v52, %v159_v51 }
 0x132   :  { %v162_v54 = vrot.slane %v161_v53, 1 }
 0x134   :  { %v163_v55 = vadd.f32 %v162_v54, %v161_v53 }
 0x136   :  { %v165_v56 = vmul.f32 0.125, %v163_v55 }
 0x138   :  { %v166_v57 = vsub.f32 %v155_v48, %v165_v56 }
 0x13a   :  { %v167_v58 = vmul.f32 %v166_v57, %v166_v57 }
 0x13c   :  { %v168_v59 = vrot.slane %v167_v58, 4 }
 0x13e   :  { %v169_v60 = vadd.f32 %v168_v59, %v167_v58  ;;  %v399_v59 = vrot.slane %v427_v0, %v180_v4 }
 0x140   :  { %v170_v61 = vrot.slane %v169_v60, 2 }
 0x142   :  { %v171_v62 = vadd.f32 %v170_v61, %v169_v60 }
 0x144   :  { %v172_v63 = vrot.slane %v171_v62, 1 }
 0x146   :  { %v173_v1 = vadd.f32 %v172_v63, %v171_v62  ;;  %v404_v62 = vrot.slane %v427_v0, %v185_v5 }
 0x148   :  { %v174_v2 = vmul.f32 0.125, %v173_v1 }
 0x14a   :  { %v175_v3 = vadd.f32 1e-05, %v174_v2 }
 0x14c   :  { %612 = vrsqrt.f32 %v175_v3 }
 0x156   :  { %v613_v7 = vpop.eup %612 }
 0x157   :  { %v177_v8 = vmul.f32 %v613_v7, %v166_v57 }
 0x159   :  { %v182_v10 = vmul.f32 %v181_v6, %v177_v8 }
 0x15b   :  { %v187_v11 = vadd.f32 %v186_v9, %v182_v10 }
 0x15d   :  { %v188_v12 = vmax.f32 %v187_v11, 0.0 }
 0x15f   :  { %511 = vmatmul.mubr.f32.vlgmr.msra.gmra.mrb[0].mxu1 %v188_v12 }
 0x232   :  { %v277_v30 = vpop.f32.mrb[0].mxu1 }
 0x233   :  { %v278_v31 = vadd.f32 %v277_v30, %v210_v29  ;;  %v512_v32 = vpop.f32.mrb[1].mxu1 }
 0x235   :  { %v281_v33 = vmul.f32 0.5, %v278_v31 }
 0x237   :  { %614 = vtanh.f32 %v281_v33 }
 0x241   :  { %v615_v34 = vpop.eup %614 }
 0x242   :  { %v283_v35 = vadd.f32 1.0, %v615_v34 }
 0x244   :  { %v284_v36 = vmul.f32 0.5, %v283_v35 }
 0x246   :  { %546 = vmatmul.mubr.f32.vlgmr.msra.gmra.mrb[2].mxu0 %v284_v36 }
 0x319   :  { %v373_v38 = vpop.f32.mrb[2].mxu0 }
 0x31a   :  { %v374_v39 = vadd.f32 %v373_v38, %v306_v37  ;;  %v547_v40 = vpop.f32.mrb[3].mxu0 }
 0x31c   :  { %v377_v41 = vrot.slane %v374_v39, 4 }
 0x31e   :  { %v378_v42 = vadd.f32 %v377_v41, %v374_v39 }
 0x320   :  { %v379_v45 = vrot.slane %v378_v42, 2 }
 0x322   :  { %v380_v46 = vadd.f32 %v379_v45, %v378_v42 }
 0x324   :  { %v381_v47 = vrot.slane %v380_v46, 1 }
 0x326   :  { %v382_v48 = vadd.f32 %v381_v47, %v380_v46 }
 0x328   :  { %v383_v49 = vmul.f32 0.125, %v382_v48 }
 0x32a   :  { %v384_v50 = vsub.f32 %v374_v39, %v383_v49 }
 0x32c   :  { %v385_v51 = vmul.f32 %v384_v50, %v384_v50 }
 0x32e   :  { %v386_v52 = vrot.slane %v385_v51, 4 }
 0x330   :  { %v387_v53 = vadd.f32 %v386_v52, %v385_v51 }
 0x332   :  { %v388_v54 = vrot.slane %v387_v53, 2 }
 0x334   :  { %v389_v55 = vadd.f32 %v388_v54, %v387_v53 }
 0x336   :  { %v390_v56 = vrot.slane %v389_v55, 1 }
 0x338   :  { %v391_v57 = vadd.f32 %v390_v56, %v389_v55 }
 0x33a   :  { %v392_v58 = vmul.f32 0.125, %v391_v57 }
 0x33c   :  { %v393_v44 = vadd.f32 1e-05, %v392_v58 }
 0x33e   :  { %616 = vrsqrt.f32 %v393_v44 }
 0x348   :  { %v617_v60 = vpop.eup %616 }
 0x349   :  { %v395_v61 = vmul.f32 %v617_v60, %v384_v50 }
 0x34b   :  { %v400_v63 = vmul.f32 %v399_v59, %v395_v61 }
 0x34d   :  { %v405_v1 = vadd.f32 %v404_v62, %v400_v63 }
 0x34f   :  { %407 = vst.msk [vmem:[#allocation10] sm:$0xff] %vm406_vm2, %v405_v1 }
 0x350   :  { %717 = shalt.err (!%p714_p8)
}
 0x351   :  { %s718_s23 = scalar_lea.hbm %s898_s5, 128 }
 0x352   :  { %p719_p9 = scmp.ne.s32.totalorder %s898_s5, %s718_s23  ;;  %p722_p10 = scmp.lt.u32.totalorder %s718_s23, %s898_s5 }
 0x354   :  { %p724_p11 = pnand %p722_p10, %p719_p9 }
 0x356   :  { %727 = shalt.err (!%p724_p11)
}
 0x357   :  { %417 = dma.vmem_to_hbm [thread:$0]  %s415_s19, 128, %s898_s5, [#allocation4]  }
 0x358   :  { %734 = dma.done.wait [#allocation4], 128  }
 0x359   :  { %735 = vsyncadd [#allocation4], 4294967168 }
 0x35a   :  { %421 = vsyncpa [#allocation3], 1 }
 0x35b   :  { %422 = vsyncpa [#allocation6], 1 }
 0x35c   :  { %423 = vsyncpa [#allocation9], 1 }
 0x35d   :  { %424 = vsyncpa [#allocation4], 1 }

</bundles_post_ra>
